<compile_context>
chip_gen: v5e
topology: v5e:2x2
jax: 0.10.0
libtpu: 0.0.40
codegen_flags: <defaults>
</compile_context>

<pallas_src>
import functools
import math

import jax
import jax.numpy as jnp
from jax.experimental import pallas as pl
from jax.experimental.pallas import tpu as pltpu


_F32_SUBLANES = 8  # f32 vreg sublane count; accumulator row count


def _round_up(x, m):
    return ((x + m - 1) // m) * m


def _mse_kernel(x_ref, t_ref, o_ref, acc_ref, *, inv_n):
    """Accumulate per-lane partial sums of (x - t)^2 across the reduction axis."""
    i = pl.program_id(1)

    @pl.when(i == 0)
    def _init():
        acc_ref[...] = jnp.zeros_like(acc_ref)

    d = x_ref[...].astype(jnp.float32) - t_ref[...].astype(jnp.float32)
    sq = d * d
    tr, lane = sq.shape
    # (tr, lane) -> (tr//8, 8, lane) splits whole (8,128) vregs, so the axis-0
    # sum is vreg-to-vreg VPU adds only — no per-step cross-lane XLU reduce and
    # no masked (1,1) read-modify-write in the hot path.
    acc_ref[...] += jnp.sum(
        sq.reshape(tr // _F32_SUBLANES, _F32_SUBLANES, lane), axis=0)

    @pl.when(i == pl.num_programs(1) - 1)
    def _finalize():
        # Lane-dense partial-sum output; the final cross-lane reduce of this
        # tiny slab is done by XLA in the wrapper.
        o_ref[...] = acc_ref[...] * inv_n


def _vmem_budgets():
    """(per-input tile budget, scoped-VMEM limit) per TPU generation."""
    phys = 64 << 20  # conservative default (v7x-sized VMEM) if query fails
    try:
        info = pltpu.get_tpu_info()
        phys = int(getattr(info, "vmem_capacity_bytes", phys))
    except Exception:
        pass
    if phys <= (64 << 20):
        # v7x-class: 64 MiB physical VMEM, ~3.2 TB/s HBM.  6 MiB/input tiles
        # keep 2 inputs x 2 pipeline buffers + scratch + temps under ~40 MiB.
        return 6 << 20, 40 << 20
    # v5e/v6e-class: 128 MiB physical VMEM.  8 MiB/input tiles; raise the
    # scoped limit explicitly so we never hit the 16/32 MiB defaults.
    return 8 << 20, 64 << 20


def _plan_layout(shape, itemsize, tile_budget):
    """Lane-dense 2D tiling plan: returns (rows, lane, row_tile, pad_elems)."""
    n = math.prod(shape)
    sub = max(8, 32 // itemsize)  # sublane quantum: 8 f32, 16 bf16, 32 int8/fp8

    def row_tile(rows, lane):
        # Whole array as one block (legal for any full row count that keeps
        # the f32 accumulator reshape valid) if it fits the budget...
        if rows % _F32_SUBLANES == 0 and rows * lane * itemsize <= tile_budget:
            return rows
        # ...else the largest multiple-of-`sub` divisor of rows in budget.
        max_k = (tile_budget // (lane * itemsize)) // sub
        for k in range(max_k, 0, -1):
            if rows % (k * sub) == 0:
                return k * sub
        return None

    # Path A (zero-copy): natural view (prod(leading dims), last-two-dims).
    if len(shape) >= 2:
        lane = shape[-1] * shape[-2]
        rows = n // lane
        if lane % 128 == 0 and rows >= 1:
            tr = row_tile(rows, lane)
            if tr is not None:
                return rows, lane, tr, 0

    # Path B (fallback): flatten fully, re-tile as (rows, k*128), zero-pad the
    # tail.  Pads contribute 0 to the squared-error sum; we divide by true n.
    lane = 512 if n >= 512 * sub else 128
    rows_raw = pl.cdiv(n, lane)
    max_tr = max(sub, ((tile_budget // (lane * itemsize)) // sub) * sub)
    tr = min(max_tr, _round_up(rows_raw, sub))
    rows = _round_up(rows_raw, tr)
    return rows, lane, tr, rows * lane - n


def mse_loss_pallas(x, target):
    """Mean-squared error between x and target (same shape), computed in Pallas."""
    assert x.shape == target.shape, (x.shape, target.shape)
    n_elems = x.size
    itemsize = jnp.dtype(x.dtype).itemsize
    tile_budget, vmem_limit = _vmem_budgets()

    rows, lane, tr, pad = _plan_layout(x.shape, itemsize, tile_budget)

    def as_2d(a):
        flat = a.reshape(-1)
        if pad:  # only for awkward shapes; zero pads add 0 to the sum
            flat = jnp.pad(flat, (0, pad))
        return flat.reshape(rows, lane)

    x2, t2 = as_2d(x), as_2d(target)

    total_steps = rows // tr
    # Split the row stream in two along a "parallel" axis: uses both
    # TensorCores on v7x (2 TCs/chip); a harmless outer serial loop on v5e/v6e.
    n_split = 2 if (total_steps > 1 and total_steps % 2 == 0) else 1
    steps = total_steps // n_split

    kernel = functools.partial(_mse_kernel, inv_n=1.0 / float(n_elems))

    out_rows = n_split * _F32_SUBLANES
    cost = pl.CostEstimate(
        flops=3 * n_elems,
        transcendentals=0,
        bytes_accessed=int(x2.size * x2.dtype.itemsize
                           + t2.size * t2.dtype.itemsize
                           + out_rows * lane * 4),
    )

    partials = pl.pallas_call(
        kernel,
        out_shape=jax.ShapeDtypeStruct((out_rows, lane), jnp.float32),
        grid_spec=pltpu.PrefetchScalarGridSpec(
            num_scalar_prefetch=0,
            grid=(n_split, steps),
            in_specs=[
                pl.BlockSpec((tr, lane), lambda s, i: (s * steps + i, 0)),
                pl.BlockSpec((tr, lane), lambda s, i: (s * steps + i, 0)),
            ],
            out_specs=pl.BlockSpec((_F32_SUBLANES, lane), lambda s, i: (s, 0)),
            scratch_shapes=[pltpu.VMEM((_F32_SUBLANES, lane), jnp.float32)],
        ),
        compiler_params=pltpu.CompilerParams(
            dimension_semantics=("parallel", "arbitrary"),
            vmem_limit_bytes=vmem_limit,
        ),
        cost_estimate=cost,
    )(x2, t2)
    # Final cross-lane reduce of the tiny partial-sum slab (already scaled by 1/n).
    return jnp.sum(partials)


class ContentLoss:
    """JAX/Pallas port of the PyTorch ContentLoss module."""

    def __init__(self, target):
        # `.detach()` has no analogue needed here: `target` is a plain array.
        self.target = target
        self.loss = jnp.float32(0.0)

    def __call__(self, x):
        self.loss = mse_loss_pallas(x, self.target)
        # Forward returns the input unchanged (identity, no extra HBM traffic).
        return x


if __name__ == "__main__":
    key = jax.random.PRNGKey(0)
    k_in, k_tgt = jax.random.split(key)

    N, C, H, W = 2, 4, 16, 16
    x = jax.random.normal(k_in, (N, C, H, W), dtype=jnp.float32)
    target = jax.random.normal(k_tgt, (N, C, H, W), dtype=jnp.float32)

    content_loss = ContentLoss(target)
    out = content_loss(x)
    out = jax.block_until_ready(out)
    loss = jax.block_until_ready(content_loss.loss)

    # Reference in plain JAX (same semantics as F.mse_loss, reduction='mean').
    ref = jnp.mean((x - target) ** 2)
    assert out.shape == x.shape
    assert jnp.allclose(out, x)
    assert jnp.allclose(loss, ref, atol=1e-6, rtol=1e-5), (loss, ref)

    print("KERNEL_OK")
</pallas_src>

<mosaic_0001>
module attributes {stable_mosaic.version = 11 : i64} {
  func.func @_mse_kernel(%arg0: i32, %arg1: i32, %arg2: memref<8x256xf32, #tpu.memory_space<vmem>>, %arg3: memref<8x256xf32, #tpu.memory_space<vmem>>, %arg4: memref<8x256xf32, #tpu.memory_space<vmem>>, %arg5: memref<8x256xf32, #tpu.memory_space<vmem>>) attributes {dimension_semantics = [#tpu.dimension_semantics<parallel>, #tpu.dimension_semantics<arbitrary>], iteration_bounds = array<i64: 1, 1>, scalar_prefetch = 0 : i64, scratch_operands = 1 : i64, tpu.core_type = #tpu.core_type<tc>, window_params = [{transform_indices = @transform_0, window_bounds = array<i64: 8, 256>}, {transform_indices = @transform_1, window_bounds = array<i64: 8, 256>}, {transform_indices = @transform_2, window_bounds = array<i64: 8, 256>}]} {
    %c0_i32 = arith.constant 0 : i32
    %0 = arith.cmpi eq, %arg1, %c0_i32 : i32
    %1 = arith.extui %0 : i1 to i32
    %c0_i32_0 = arith.constant 0 : i32
    %2 = arith.cmpi ne, %1, %c0_i32_0 : i32
    scf.if %2 {
      %cst_10 = arith.constant 0.000000e+00 : f32
      %15 = vector.broadcast %cst_10 : f32 to vector<8x256xf32>
      %c0_11 = arith.constant 0 : index
      %c0_12 = arith.constant 0 : index
      %16 = vector.load %arg5[%c0_11, %c0_12] : memref<8x256xf32, #tpu.memory_space<vmem>>, vector<8x256xf32>
      tpu.vector_store %arg5[%c0_11, %c0_12], %15 {strides = array<i32>} : memref<8x256xf32, #tpu.memory_space<vmem>>, vector<8x256xf32>,
    } else {
    }
    %c0 = arith.constant 0 : index
    %c0_1 = arith.constant 0 : index
    %3 = vector.load %arg2[%c0, %c0_1] : memref<8x256xf32, #tpu.memory_space<vmem>>, vector<8x256xf32>
    %c0_2 = arith.constant 0 : index
    %c0_3 = arith.constant 0 : index
    %4 = vector.load %arg3[%c0_2, %c0_3] : memref<8x256xf32, #tpu.memory_space<vmem>>, vector<8x256xf32>
    %5 = arith.subf %3, %4 : vector<8x256xf32>
    %6 = arith.mulf %5, %5 : vector<8x256xf32>
    %c0_4 = arith.constant 0 : index
    %c0_5 = arith.constant 0 : index
    %7 = vector.load %arg5[%c0_4, %c0_5] : memref<8x256xf32, #tpu.memory_space<vmem>>, vector<8x256xf32>
    %8 = vector.shape_cast %6 : vector<8x256xf32> to vector<1x8x256xf32>
    %cst = arith.constant dense<0.000000e+00> : vector<8x256xf32>
    %9 = vector.multi_reduction <add>, %8, %cst [0] : vector<1x8x256xf32> to vector<8x256xf32>
    %10 = arith.addf %7, %9 : vector<8x256xf32>
    %c0_6 = arith.constant 0 : index
    %c0_7 = arith.constant 0 : index
    %11 = vector.load %arg5[%c0_6, %c0_7] : memref<8x256xf32, #tpu.memory_space<vmem>>, vector<8x256xf32>
    tpu.vector_store %arg5[%c0_6, %c0_7], %10 {strides = array<i32>} : memref<8x256xf32, #tpu.memory_space<vmem>>, vector<8x256xf32>,
    %c0_i32_8 = arith.constant 0 : i32
    %12 = arith.cmpi eq, %arg1, %c0_i32_8 : i32
    %13 = arith.extui %12 : i1 to i32
    %c0_i32_9 = arith.constant 0 : i32
    %14 = arith.cmpi ne, %13, %c0_i32_9 : i32
    scf.if %14 {
      %c0_10 = arith.constant 0 : index
      %c0_11 = arith.constant 0 : index
      %15 = vector.load %arg5[%c0_10, %c0_11] : memref<8x256xf32, #tpu.memory_space<vmem>>, vector<8x256xf32>
      %cst_12 = arith.constant 4.8828125E-4 : f32
      %16 = vector.broadcast %cst_12 : f32 to vector<8x256xf32>
      %17 = arith.mulf %15, %16 : vector<8x256xf32>
      %c0_13 = arith.constant 0 : index
      %c0_14 = arith.constant 0 : index
      %18 = vector.load %arg4[%c0_13, %c0_14] : memref<8x256xf32, #tpu.memory_space<vmem>>, vector<8x256xf32>
      tpu.vector_store %arg4[%c0_13, %c0_14], %17 {strides = array<i32>} : memref<8x256xf32, #tpu.memory_space<vmem>>, vector<8x256xf32>,
    } else {
    }
    return
  }
  func.func @transform_0(%arg0: i32, %arg1: i32) -> (i32, i32) {
    %c1_i32 = arith.constant 1 : i32
    %0 = arith.muli %arg0, %c1_i32 : i32
    %1 = arith.addi %0, %arg1 : i32
    %c0_i32 = arith.constant 0 : i32
    %c0_i32_0 = arith.constant 0 : i32
    return %1, %c0_i32 : i32, i32
  }
  func.func @transform_1(%arg0: i32, %arg1: i32) -> (i32, i32) {
    %c1_i32 = arith.constant 1 : i32
    %0 = arith.muli %arg0, %c1_i32 : i32
    %1 = arith.addi %0, %arg1 : i32
    %c0_i32 = arith.constant 0 : i32
    %c0_i32_0 = arith.constant 0 : i32
    return %1, %c0_i32 : i32, i32
  }
  func.func @transform_2(%arg0: i32, %arg1: i32) -> (i32, i32) {
    %c0_i32 = arith.constant 0 : i32
    %c0_i32_0 = arith.constant 0 : i32
    return %arg0, %c0_i32 : i32, i32
  }
}

</mosaic_0001>

<bundles_post_ra>
// kernel: tpu_custom_call.1
= control target key start
LH: loop header
LB: loop body
LE: loop exit
PB: predicated region body
PF: predicated region fallthrough
CT: control target
= control target key end

     0   :  { %7 = vsyncpa [#allocation4], 0  ;;  %s207_s0 = inlined_call_operand.hbm [shape: f32[8,256], index: 0, kind: input, shape index: {}]   ;;  %s208_s1 = inlined_call_operand.hbm [shape: f32[8,256], index: 1, kind: input, shape index: {}]   ;;  %s209_s2 = inlined_call_operand.hbm [shape: f32[8,256], index: 2, kind: output, shape index: {}]  }
   0x1   :  { %8 = vsyncpa [#allocation7], 0 }
   0x2   :  { %9 = vsyncpa [#allocation5], 0  ;;  %s19_s11 = sshll.u32 %s207_s0, 4  ;;  %s180_s12 = smov [#allocation3]   ;;  %s20_s11 = int_to_ptr.hbm [resolvable:$true] %s19_s11 }
   0x3   :  { %s21_s13 = sshll.u32 %s180_s12, 4  ;;  %s34_s16 = sshll.u32 %s208_s1, 4  ;;  %s22_s13 = int_to_ptr.vmem [resolvable:$true] %s21_s13  ;;  %s35_s16 = int_to_ptr.hbm [resolvable:$true] %s34_s16 }
   0x4   :  { %24 = dma.hbm_to_vmem [thread:$0]  %s20_s11, 256, %s22_s13, [#allocation4]  }
   0x5   :  { %s181_s17 = smov [#allocation6]  }
   0x6   :  { %s36_s18 = sshll.u32 %s181_s17, 4  ;;  %s37_s18 = int_to_ptr.vmem [resolvable:$true] %s36_s18 }
   0x7   :  { %39 = dma.hbm_to_vmem [thread:$0]  %s35_s16, 256, %s37_s18, [#allocation7]  }
   0x8   :  { %174 = dma.done.wait [#allocation4], 256  }
   0x9   :  { %175 = vsyncadd [#allocation4], 4294967040 }
   0xa   :  { %176 = dma.done.wait [#allocation7], 256  }
   0xb   :  { %177 = vsyncadd [#allocation7], 4294967040  ;;  %v56_v0 = vld [vmem:[#allocation3] sm:$0xff]  ;;  %v58_v1 = vld [vmem:[#allocation6] sm:$0xff]  ;;  %s182_s0 = smov [#allocation8]   ;;  %s88_s21 = sshll.u32 %s209_s2, 4  ;;  %s89_s21 = int_to_ptr.hbm [resolvable:$true] %s88_s21 }
   0xc   :  { %v57_v2 = vld [vmem:[#allocation3 + $0x8] sm:$0xff]  ;;  %v60_v3 = vsub.f32 %v56_v0, %v58_v1  ;;  %v59_v4 = vld [vmem:[#allocation6 + $0x8] sm:$0xff]  ;;  %s86_s19 = sshll.u32 %s182_s0, 4  ;;  %s87_s19 = int_to_ptr.vmem [resolvable:$true] %s86_s19 }
   0xd   :  { %v61_v5 = vsub.f32 %v57_v2, %v59_v4 }
   0xe   :  { %v62_v6 = vmul.f32 %v60_v3, %v60_v3 }
   0xf   :  { %v63_v7 = vmul.f32 %v61_v5, %v61_v5 }
  0x10   :  { %v77_v8 = vmul.f32 0.00048828125, %v62_v6 }
  0x11   :  { %v78_v9 = vmul.f32 0.00048828125, %v63_v7 }
  0x12   :  { %79 = vst [vmem:[#allocation8] sm:$0xff] %v77_v8 }
  0x13   :  { %80 = vst [vmem:[#allocation8 + $0x8] sm:$0xff] %v78_v9 }
  0x14   :  { %91 = dma.vmem_to_hbm [thread:$0]  %s87_s19, 256, %s89_s21, [#allocation5]  }
  0x15   :  { %178 = dma.done.wait [#allocation5], 256  }
  0x16   :  { %179 = vsyncadd [#allocation5], 4294967040 }
  0x17   :  { %96 = vsyncpa [#allocation4], 1 }
  0x18   :  { %97 = vsyncpa [#allocation7], 1 }
  0x19   :  { %98 = vsyncpa [#allocation5], 1 }

</bundles_post_ra>
